<compile_context>
chip_gen: v7x
topology: tpu7x:2x2x1
jax: 0.10.0
libtpu: 0.0.40
codegen_flags: <defaults>
</compile_context>

<pallas_src>
import functools

import jax
import jax.numpy as jnp
from jax.experimental import pallas as pl
from jax.experimental.pallas import tpu as pltpu


def _outconv_kernel_vpu(w_ref, b_ref, x_ref, o_ref):
    """Tiny-channel path: unrolled VPU multiply-adds, weights/bias in SMEM.

    w_ref: SMEM (Cout*Cin,) f32   b_ref: SMEM (Cout,) f32
    x_ref: VMEM (1, Cin, TS)      o_ref: VMEM (1, Cout, TS)
    """
    cin = x_ref.shape[1]
    cout = o_ref.shape[1]
    x = x_ref[0].astype(jnp.float32)              # (Cin, TS), lane-dense
    rows = []
    for o in range(cout):                         # static unroll (tiny Cout)
        acc = x[0:1, :] * w_ref[o * cin + 0]
        for c in range(1, cin):                   # static unroll (tiny Cin)
            acc = acc + x[c:c + 1, :] * w_ref[o * cin + c]
        rows.append(acc + b_ref[o])               # bias already f32 (hoisted cast)
    out = jnp.concatenate(rows, axis=0)           # (Cout, TS)
    o_ref[0] = out.astype(o_ref.dtype)


def _outconv_kernel_mxu(w_ref, b_ref, x_ref, o_ref):
    """Generic-channel path: (Cout,Cin) @ (Cin,TS) on the MXU, H*W on lanes.

    w_ref: VMEM (Cout, Cin)       b_ref: VMEM (Cout, 1) f32
    x_ref: VMEM (1, Cin, TS)      o_ref: VMEM (1, Cout, TS)
    """
    acc = jnp.dot(w_ref[...], x_ref[0], preferred_element_type=jnp.float32)
    o_ref[0] = (acc + b_ref[...]).astype(o_ref.dtype)


def _round_up(a, b):
    return ((a + b - 1) // b) * b


@functools.partial(jax.jit, static_argnames=("tile_s",))
def outconv_pallas(x_nchw, weight, bias, *, tile_s=1024):
    """1x1 conv: x (N, Cin, H, W), weight (Cout, Cin, 1, 1), bias (Cout,)."""
    N, Cin, H, W = x_nchw.shape
    Cout = weight.shape[0]
    HW = H * W

    # Lane-dense spatial tile: multiple of 128, no larger than the (padded) row.
    tile_s = max(128, min(int(tile_s), _round_up(HW, 128)))
    tile_s = _round_up(tile_s, 128)
    HW_pad = _round_up(HW, tile_s)

    # Free view, no transpose: NCHW -> (N, Cin, H*W).
    x3 = x_nchw.reshape(N, Cin, HW)
    if HW_pad != HW:
        x3 = jnp.pad(x3, ((0, 0), (0, 0), (0, HW_pad - HW)))

    w2 = weight.reshape(Cout, Cin)
    grid = (N, HW_pad // tile_s)

    use_vpu = (Cin * Cout) <= 64  # tiny contraction -> skip the MXU entirely

    if use_vpu:
        kernel = _outconv_kernel_vpu
        w_arg = w2.reshape(Cout * Cin).astype(jnp.float32)   # SMEM scalars
        b_arg = bias.astype(jnp.float32)                      # SMEM scalars (cast hoisted)
        in_specs = [
            pl.BlockSpec(memory_space=pltpu.MemorySpace.SMEM),
            pl.BlockSpec(memory_space=pltpu.MemorySpace.SMEM),
            pl.BlockSpec((1, Cin, tile_s), lambda n, s: (n, 0, s)),
        ]
    else:
        kernel = _outconv_kernel_mxu
        w_arg = w2.astype(x_nchw.dtype)                       # resident VMEM
        b_arg = bias.astype(jnp.float32).reshape(Cout, 1)     # resident VMEM
        in_specs = [
            pl.BlockSpec((Cout, Cin), lambda n, s: (0, 0)),
            pl.BlockSpec((Cout, 1), lambda n, s: (0, 0)),
            pl.BlockSpec((1, Cin, tile_s), lambda n, s: (n, 0, s)),
        ]

    out3 = pl.pallas_call(
        kernel,
        out_shape=jax.ShapeDtypeStruct((N, Cout, HW_pad), x_nchw.dtype),
        grid_spec=pltpu.PrefetchScalarGridSpec(
            num_scalar_prefetch=0,
            grid=grid,
            in_specs=in_specs,
            out_specs=pl.BlockSpec((1, Cout, tile_s), lambda n, s: (n, 0, s)),
        ),
        compiler_params=pltpu.CompilerParams(
            # Batch axis + spatial-tile axis are both independent; on v7x the
            # parallel axes shard across the 2 TensorCores, no-op on v5e/v6e.
            dimension_semantics=("parallel", "parallel"),
        ),
    )(w_arg, b_arg, x3)

    if HW_pad != HW:
        out3 = out3[:, :, :HW]
    return out3.reshape(N, Cout, H, W)


if __name__ == "__main__":
    key = jax.random.PRNGKey(0)
    k_x, k_w, k_b = jax.random.split(key, 3)

    # Small shapes consistent with the module: batch=2, in_channels=4,
    # out_channels=3, spatial 16x16.
    N, Cin, Cout, H, W = 2, 4, 3, 16, 16

    x = jax.random.normal(k_x, (N, Cin, H, W), dtype=jnp.float32)
    # Deterministic parameter init (synthetic; mimics Conv2d(..., kernel_size=1) shapes).
    bound = 1.0 / (Cin ** 0.5)
    weight = jax.random.uniform(k_w, (Cout, Cin, 1, 1), dtype=jnp.float32,
                                minval=-bound, maxval=bound)
    bias = jax.random.uniform(k_b, (Cout,), dtype=jnp.float32,
                              minval=-bound, maxval=bound)

    out = outconv_pallas(x, weight, bias)
    out = jax.block_until_ready(out)

    # Reference check against plain-JAX 1x1 conv semantics (== torch Conv2d k=1).
    ref = (jnp.einsum("nchw,oc->nohw", x, weight.reshape(Cout, Cin))
           + bias[None, :, None, None])
    assert out.shape == (N, Cout, H, W)
    assert jnp.allclose(out, ref, atol=1e-5, rtol=1e-5)

    print("KERNEL_OK")
</pallas_src>

<mosaic_0001>
module attributes {stable_mosaic.version = 11 : i64} {
  func.func @_outconv_kernel_vpu(%arg0: i32, %arg1: i32, %arg2: memref<12xf32, #tpu.memory_space<smem>>, %arg3: memref<3xf32, #tpu.memory_space<smem>>, %arg4: memref<1x4x256xf32, #tpu.memory_space<vmem>>, %arg5: memref<1x3x256xf32, #tpu.memory_space<vmem>>) attributes {dimension_semantics = [#tpu.dimension_semantics<parallel>, #tpu.dimension_semantics<parallel>], iteration_bounds = array<i64: 2, 1>, scalar_prefetch = 0 : i64, scratch_operands = 0 : i64, tpu.core_type = #tpu.core_type<tc>, window_params = [{transform_indices = @transform_0, window_bounds = array<i64: 12>}, {transform_indices = @transform_1, window_bounds = array<i64: 3>}, {transform_indices = @transform_2, window_bounds = array<i64: 1, 4, 256>}, {transform_indices = @transform_3, window_bounds = array<i64: 1, 3, 256>}]} {
    %c0 = arith.constant 0 : index
    %c0_0 = arith.constant 0 : index
    %c0_1 = arith.constant 0 : index
    %0 = vector.load %arg4[%c0, %c0_0, %c0_1] : memref<1x4x256xf32, #tpu.memory_space<vmem>>, vector<1x4x256xf32>
    %1 = vector.shape_cast %0 : vector<1x4x256xf32> to vector<4x256xf32>
    %2 = vector.extract_strided_slice %1 {offsets = [0, 0], sizes = [1, 256], strides = [1, 1]} : vector<4x256xf32> to vector<1x256xf32>
    %c0_2 = arith.constant 0 : index
    %3 = memref.load %arg2[%c0_2] : memref<12xf32, #tpu.memory_space<smem>>
    %4 = vector.broadcast %3 : f32 to vector<1x256xf32>
    %5 = arith.mulf %2, %4 : vector<1x256xf32>
    %6 = vector.extract_strided_slice %1 {offsets = [1, 0], sizes = [1, 256], strides = [1, 1]} : vector<4x256xf32> to vector<1x256xf32>
    %c1 = arith.constant 1 : index
    %7 = memref.load %arg2[%c1] : memref<12xf32, #tpu.memory_space<smem>>
    %8 = vector.broadcast %7 : f32 to vector<1x256xf32>
    %9 = arith.mulf %6, %8 : vector<1x256xf32>
    %10 = arith.addf %5, %9 : vector<1x256xf32>
    %11 = vector.extract_strided_slice %1 {offsets = [2, 0], sizes = [1, 256], strides = [1, 1]} : vector<4x256xf32> to vector<1x256xf32>
    %c2 = arith.constant 2 : index
    %12 = memref.load %arg2[%c2] : memref<12xf32, #tpu.memory_space<smem>>
    %13 = vector.broadcast %12 : f32 to vector<1x256xf32>
    %14 = arith.mulf %11, %13 : vector<1x256xf32>
    %15 = arith.addf %10, %14 : vector<1x256xf32>
    %16 = vector.extract_strided_slice %1 {offsets = [3, 0], sizes = [1, 256], strides = [1, 1]} : vector<4x256xf32> to vector<1x256xf32>
    %c3 = arith.constant 3 : index
    %17 = memref.load %arg2[%c3] : memref<12xf32, #tpu.memory_space<smem>>
    %18 = vector.broadcast %17 : f32 to vector<1x256xf32>
    %19 = arith.mulf %16, %18 : vector<1x256xf32>
    %20 = arith.addf %15, %19 : vector<1x256xf32>
    %c0_3 = arith.constant 0 : index
    %21 = memref.load %arg3[%c0_3] : memref<3xf32, #tpu.memory_space<smem>>
    %22 = vector.broadcast %21 : f32 to vector<1x256xf32>
    %23 = arith.addf %20, %22 : vector<1x256xf32>
    %24 = vector.extract_strided_slice %1 {offsets = [0, 0], sizes = [1, 256], strides = [1, 1]} : vector<4x256xf32> to vector<1x256xf32>
    %c4 = arith.constant 4 : index
    %25 = memref.load %arg2[%c4] : memref<12xf32, #tpu.memory_space<smem>>
    %26 = vector.broadcast %25 : f32 to vector<1x256xf32>
    %27 = arith.mulf %24, %26 : vector<1x256xf32>
    %28 = vector.extract_strided_slice %1 {offsets = [1, 0], sizes = [1, 256], strides = [1, 1]} : vector<4x256xf32> to vector<1x256xf32>
    %c5 = arith.constant 5 : index
    %29 = memref.load %arg2[%c5] : memref<12xf32, #tpu.memory_space<smem>>
    %30 = vector.broadcast %29 : f32 to vector<1x256xf32>
    %31 = arith.mulf %28, %30 : vector<1x256xf32>
    %32 = arith.addf %27, %31 : vector<1x256xf32>
    %33 = vector.extract_strided_slice %1 {offsets = [2, 0], sizes = [1, 256], strides = [1, 1]} : vector<4x256xf32> to vector<1x256xf32>
    %c6 = arith.constant 6 : index
    %34 = memref.load %arg2[%c6] : memref<12xf32, #tpu.memory_space<smem>>
    %35 = vector.broadcast %34 : f32 to vector<1x256xf32>
    %36 = arith.mulf %33, %35 : vector<1x256xf32>
    %37 = arith.addf %32, %36 : vector<1x256xf32>
    %38 = vector.extract_strided_slice %1 {offsets = [3, 0], sizes = [1, 256], strides = [1, 1]} : vector<4x256xf32> to vector<1x256xf32>
    %c7 = arith.constant 7 : index
    %39 = memref.load %arg2[%c7] : memref<12xf32, #tpu.memory_space<smem>>
    %40 = vector.broadcast %39 : f32 to vector<1x256xf32>
    %41 = arith.mulf %38, %40 : vector<1x256xf32>
    %42 = arith.addf %37, %41 : vector<1x256xf32>
    %c1_4 = arith.constant 1 : index
    %43 = memref.load %arg3[%c1_4] : memref<3xf32, #tpu.memory_space<smem>>
    %44 = vector.broadcast %43 : f32 to vector<1x256xf32>
    %45 = arith.addf %42, %44 : vector<1x256xf32>
    %46 = vector.extract_strided_slice %1 {offsets = [0, 0], sizes = [1, 256], strides = [1, 1]} : vector<4x256xf32> to vector<1x256xf32>
    %c8 = arith.constant 8 : index
    %47 = memref.load %arg2[%c8] : memref<12xf32, #tpu.memory_space<smem>>
    %48 = vector.broadcast %47 : f32 to vector<1x256xf32>
    %49 = arith.mulf %46, %48 : vector<1x256xf32>
    %50 = vector.extract_strided_slice %1 {offsets = [1, 0], sizes = [1, 256], strides = [1, 1]} : vector<4x256xf32> to vector<1x256xf32>
    %c9 = arith.constant 9 : index
    %51 = memref.load %arg2[%c9] : memref<12xf32, #tpu.memory_space<smem>>
    %52 = vector.broadcast %51 : f32 to vector<1x256xf32>
    %53 = arith.mulf %50, %52 : vector<1x256xf32>
    %54 = arith.addf %49, %53 : vector<1x256xf32>
    %55 = vector.extract_strided_slice %1 {offsets = [2, 0], sizes = [1, 256], strides = [1, 1]} : vector<4x256xf32> to vector<1x256xf32>
    %c10 = arith.constant 10 : index
    %56 = memref.load %arg2[%c10] : memref<12xf32, #tpu.memory_space<smem>>
    %57 = vector.broadcast %56 : f32 to vector<1x256xf32>
    %58 = arith.mulf %55, %57 : vector<1x256xf32>
    %59 = arith.addf %54, %58 : vector<1x256xf32>
    %60 = vector.extract_strided_slice %1 {offsets = [3, 0], sizes = [1, 256], strides = [1, 1]} : vector<4x256xf32> to vector<1x256xf32>
    %c11 = arith.constant 11 : index
    %61 = memref.load %arg2[%c11] : memref<12xf32, #tpu.memory_space<smem>>
    %62 = vector.broadcast %61 : f32 to vector<1x256xf32>
    %63 = arith.mulf %60, %62 : vector<1x256xf32>
    %64 = arith.addf %59, %63 : vector<1x256xf32>
    %c2_5 = arith.constant 2 : index
    %65 = memref.load %arg3[%c2_5] : memref<3xf32, #tpu.memory_space<smem>>
    %66 = vector.broadcast %65 : f32 to vector<1x256xf32>
    %67 = arith.addf %64, %66 : vector<1x256xf32>
    %68 = tpu.concatenate %23, %45, %67 in 0 : vector<1x256xf32>, vector<1x256xf32>, vector<1x256xf32> -> vector<3x256xf32>
    %c0_6 = arith.constant 0 : index
    %c0_7 = arith.constant 0 : index
    %c0_8 = arith.constant 0 : index
    %69 = vector.load %arg5[%c0_6, %c0_7, %c0_8] : memref<1x3x256xf32, #tpu.memory_space<vmem>>, vector<1x3x256xf32>
    %70 = vector.shape_cast %69 : vector<1x3x256xf32> to vector<3x256xf32>
    %71 = vector.shape_cast %68 : vector<3x256xf32> to vector<1x3x256xf32>
    tpu.vector_store %arg5[%c0_6, %c0_7, %c0_8], %71 {strides = array<i32>} : memref<1x3x256xf32, #tpu.memory_space<vmem>>, vector<1x3x256xf32>,
    return
  }
  func.func @transform_0(%arg0: i32, %arg1: i32) -> i32 {
    %c0_i32 = arith.constant 0 : i32
    %c0_i32_0 = arith.constant 0 : i32
    return %c0_i32 : i32
  }
  func.func @transform_1(%arg0: i32, %arg1: i32) -> i32 {
    %c0_i32 = arith.constant 0 : i32
    %c0_i32_0 = arith.constant 0 : i32
    return %c0_i32 : i32
  }
  func.func @transform_2(%arg0: i32, %arg1: i32) -> (i32, i32, i32) {
    %c0_i32 = arith.constant 0 : i32
    %c0_i32_0 = arith.constant 0 : i32
    return %arg0, %c0_i32, %arg1 : i32, i32, i32
  }
  func.func @transform_3(%arg0: i32, %arg1: i32) -> (i32, i32, i32) {
    %c0_i32 = arith.constant 0 : i32
    %c0_i32_0 = arith.constant 0 : i32
    return %arg0, %c0_i32, %arg1 : i32, i32, i32
  }
}

</mosaic_0001>

<bundles_post_ra>
// kernel: outconv_pallas.1
= control target key start
LH: loop header
LB: loop body
LE: loop exit
PB: predicated region body
PF: predicated region fallthrough
CT: control target
= control target key end

     0   :  { %8 = vsyncpa [#allocation3], 0  ;;  %s744_s0 = inlined_call_operand.vmem [shape: f32[12], index: 0, kind: input, shape index: {}]   ;;  %s745_s1 = inlined_call_operand.vmem [shape: f32[3], index: 1, kind: input, shape index: {}]   ;;  %s746_s2 = inlined_call_operand.vmem [shape: f32[2,4,256], index: 2, kind: input, shape index: {}]   ;;  %s747_s3 = inlined_call_operand.vmem [shape: f32[2,3,256], index: 3, kind: output, shape index: {}]  }
   0x1   :  { %9 = vsyncpa [#allocation5], 0  ;;  %s649_s12 = smov 0   ;;  %s651_s13 = smov 0  }
   0x2   :  { %s653_s14 = smov 0  }
   0x3 LB: > { %s481_s15 = sadd.s32 4294967295, %s625_s14   ;;  %s27_s16 = sadd.s32 1, %s621_s13  ;;  %s625_s14 = sphi %s653_s14, %s15_s14   ;;  %s621_s13 = sphi %s651_s13, %s757_s13   ;;  %s617_s12 = sphi %s649_s12, %s756_s12  }
   0x4   : > { %p29_p0 = scmp.ge.s32.totalorder %s27_s16, 2  ;;  %p483_p1 = scmp.ge.s32.totalorder %s625_s14, 1 }
   0x5   : > { %p130_p2 = scmp.lt.s32.totalorder %s625_s14, 3  ;;  %p674_p4 = scmp.eq.s32.totalorder %s481_s15, 0 }
   0x6   : > { %s759_s16 = smov (%p29_p0, %s27_s16), 0  ;;  %s143_s21 = sshll.u32 %s744_s0, 4  ;;  %s144_s21 = int_to_ptr.vmem [resolvable:$true] %s143_s21 }
   0x7   : > { %p670_p3 = pnand %p483_p1, %p130_p2  ;;  %s154_s24 = sshll.u32 %s745_s1, 4  ;;  %s155_s24 = int_to_ptr.vmem [resolvable:$true] %s154_s24 }
   0x8   : > { %s752_s18 = scalar_select %p674_p4, 1, 0 }
   0x9   : > { %s751_s17 = scalar_select %p670_p3, 1, 0 }
   0xa   : > { %p528_p5 = pneg %p670_p3  ;;  %s565_s26 = scalar_lea.vmem %s144_s21, 16 }
   0xb   : > { %p566_p7 = scmp.ne.s32.totalorder %s144_s21, %s565_s26  ;;  %p573_p11 = scmp.lt.s32.totalorder %s144_s21, %s144_s21 }
   0xc   : > { %p688_p6 = pnand %p674_p4, %p528_p5  ;;  %p574_p12 = scmp.lt.s32.totalorder %s565_s26, %s565_s26 }
   0xe   : > { %p567_p8 = pneg %p688_p6  ;;  %p575_p13 = por %p574_p12, %p573_p11 }
  0x10   : > { %p568_p9 = pnand %p567_p8, %p566_p7 }
  0x12   : > { %p569_p10 = pneg %p568_p9 }
  0x14   : > { %p576_p0 = pnand %p575_p13, %p569_p10 }
  0x16   : > { %579 = shalt.err (!%p576_p0)
}
  0x17   : > { %s627_s27 = smov [#allocation2]   ;;  %s580_s28 = scalar_lea.vmem %s155_s24, 16 }
  0x18   : > { %531 = dma.vmem_to_smem (!%p688_p6), %s144_s21, 16, %s627_s27, [#allocation3]  }
  0x19   : > { %p581_p1 = scmp.ne.s32.totalorder %s155_s24, %s580_s28  ;;  %p588_p4 = scmp.lt.s32.totalorder %s155_s24, %s155_s24 }
  0x1a   : > { %p589_p3 = scmp.lt.s32.totalorder %s580_s28, %s580_s28 }
  0x1b   : > { %p583_p2 = pnand %p581_p1, %p567_p8 }
  0x1c   : > { %p590_p7 = por %p589_p3, %p588_p4 }
  0x1d   : > { %p584_p5 = pneg %p583_p2 }
  0x1f   : > { %p591_p9 = pnand %p590_p7, %p584_p5 }
  0x21   : > { %594 = shalt.err (!%p591_p9)
}
  0x22   : > { %s628_s29 = smov [#allocation4]   ;;  %p754_p10 = scmp.ne.s32.totalorder %s751_s17, 0 }
  0x23   : > { %534 = dma.vmem_to_smem (!%p688_p6), %s155_s24, 16, %s628_s29, [#allocation5]  }
  0x24   : > { %180 = sbr.rel (%p754_p10) target bundleno = 81 (0x51), region = 32  ;;  %p755_p11 = scmp.ne.s32.totalorder (!%p754_p10), %s752_s18, 0 }
  0x2b   : > { %608 = dma.done.wait (%p755_p11), [#allocation3], 16  }
  0x2c   : > { %610 = vsyncadd (%p755_p11), [#allocation3], 4294967280 }
  0x2d   : > { %612 = dma.done.wait (%p755_p11), [#allocation5], 16  }
  0x2e   : > { %614 = vsyncadd (%p755_p11), [#allocation5], 4294967280 }
  0x2f   : > { %190 = sfence }
  0x30   : > { %p218_p3 = scmp.lt.s32.totalorder %s617_s12, 1  ;;  %s238_s30 = sld [smem:[#allocation2]]  ;;  %v329_v4 = vlaneseq  ;;  %vm361_vm0 = vcmask 1040384   ;;  %vm364_vm1 = vcmask 1041408  }
  0x31   : > { %s494_s4 = sld [smem:[#allocation2 + $0x1]]  ;;  %s496_s5 = sld [smem:[#allocation2 + $0x2]] }
  0x32   : > { %s761_s12 = smov (!%p218_p3, %s617_s12), 1  ;;  %s498_s6 = sld [smem:[#allocation2 + $0x3]]  ;;  %v330_v14 = vshrl.u32 %v329_v4, 7 }
  0x33   : > { %s712_s7 = sld [smem:[#allocation4]]  ;;  %s518_s8 = sshll.u32 %s761_s12, 3 }
  0x34   : > { %s500_s9 = sld [smem:[#allocation2 + $0x4]]  ;;  %s225_s15 = scalar_lea.vmem %s746_s2, %s518_s8  ;;  %v331_v40 = vsub.s32 0, %v330_v14  ;;  %v335_v41 = vsub.s32 4, %v330_v14 }
  0x35   : > { %v237_v0 = vld [vmem:[%s225_s15] sm:$0xff]  ;;  %s501_s17 = sld [smem:[#allocation2 + $0x5]]  ;;  %s503_s18 = sld [smem:[#allocation2 + $0x6]] }
  0x36   : > { %v239_v1 = vstv %s238_s30  ;;  %s505_s19 = sld [smem:[#allocation2 + $0x7]]  ;;  %s508_s20 = sld [smem:[#allocation2 + $0x8]] }
  0x37   : > { %v242_v2 = vstv %s494_s4  ;;  %v250_v3 = vstv %s496_s5  ;;  %v240_v5 = vmul.f32 %v239_v1, %v237_v0  ;;  %s509_s21 = sld [smem:[#allocation2 + $0x9]]  ;;  %s720_s22 = sld [smem:[#allocation2 + $0xa]] }
  0x38   : > { %v243_v6 = vmul.f32 %v242_v2, %v237_v0  ;;  %v251_v7 = vmul.f32 %v250_v3, %v237_v0  ;;  %v258_v8 = vstv %s498_s6  ;;  %s722_s23 = sld [smem:[#allocation2 + $0xb]]  ;;  %s725_s24 = sld [smem:[#allocation4 + $0x1]] }
  0x39   : > { %v259_v11 = vmul.f32 %v258_v8, %v237_v0  ;;  %v266_v13 = vstv %s712_s7  ;;  %s515_s25 = sld [smem:[#allocation4 + $0x2]]  ;;  %s235_s28 = scalar_lea.vmem %s747_s3, %s518_s8 }
  0x3a   : > { %v495_v9 = vrot.slane %v243_v6, 9  ;;  %v497_v10 = vrot.slane %v251_v7, 10  ;;  %v269_v12 = vstv %s500_s9 }
  0x3b   : > { %v499_v16 = vrot.slane %v259_v11, 11  ;;  %v272_v17 = vstv %s501_s17  ;;  %v280_v18 = vstv %s503_s18  ;;  %v270_v19 = vmul.f32 %v269_v12, %v237_v0 }
  0x3c   : > { %v248_v15 = vadd.f32 %v495_v9, %v240_v5  ;;  %v273_v20 = vmul.f32 %v272_v17, %v237_v0  ;;  %v281_v21 = vmul.f32 %v280_v18, %v237_v0  ;;  %v288_v22 = vstv %s505_s19 }
  0x3d   : > { %v289_v24 = vmul.f32 %v288_v22, %v237_v0  ;;  %v299_v25 = vstv %s508_s20  ;;  %v302_v26 = vstv %s509_s21  ;;  %v310_v33 = vstv %s720_s22 }
  0x3e   : > { %v256_v23 = vadd.f32 %v497_v10, %v248_v15  ;;  %v502_v27 = vrot.slane %v273_v20, 9  ;;  %v504_v28 = vrot.slane %v281_v21, 10  ;;  %v300_v29 = vmul.f32 %v299_v25, %v237_v0 }
  0x3f   : > { %v303_v30 = vmul.f32 %v302_v26, %v237_v0  ;;  %v506_v32 = vrot.slane %v289_v24, 11  ;;  %v318_v34 = vstv %s722_s23  ;;  %v311_v37 = vmul.f32 %v310_v33, %v237_v0 }
  0x40   : > { %v264_v31 = vadd.f32 %v499_v16, %v256_v23  ;;  %v278_v35 = vadd.f32 %v502_v27, %v270_v19  ;;  %v319_v38 = vmul.f32 %v318_v34, %v237_v0  ;;  %v296_v46 = vstv %s725_s24 }
  0x41   : > { %v510_v36 = vrot.slane %v303_v30, 9  ;;  %v512_v44 = vrot.slane %v311_v37, 10  ;;  %v326_v49 = vstv %s515_s25 }
  0x42   : > { %v267_v39 = vadd.f32 %v266_v13, %v264_v31  ;;  %v286_v42 = vadd.f32 %v504_v28, %v278_v35  ;;  %v514_v45 = vrot.slane %v319_v38, 11 }
  0x43   : > { %v308_v43 = vadd.f32 %v510_v36, %v300_v29 }
  0x44   : > { %v294_v47 = vadd.f32 %v506_v32, %v286_v42  ;;  %v332_v52 = vrot.slane %v267_v39, %v331_v40  ;;  %v336_v53 = vrot.slane %v267_v39, %v335_v41 }
  0x45   : > { %v316_v48 = vadd.f32 %v512_v44, %v308_v43 }
  0x46   : > { %v297_v50 = vadd.f32 %v296_v46, %v294_v47 }
  0x47   : > { %v324_v51 = vadd.f32 %v514_v45, %v316_v48 }
  0x48   : > { %v343_v55 = vrot.slane %v297_v50, %v331_v40  ;;  %v347_v56 = vrot.slane %v297_v50, %v335_v41 }
  0x49   : > { %v327_v54 = vadd.f32 %v326_v49, %v324_v51 }
  0x4a   : > { %v362_v59 = vsel %vm361_vm0, %v332_v52, %v343_v55  ;;  %v363_v60 = vsel %vm361_vm0, %v336_v53, %v347_v56 }
  0x4b   : > { %v354_v57 = vrot.slane %v327_v54, %v331_v40  ;;  %v358_v58 = vrot.slane %v327_v54, %v335_v41 }
  0x4d   : > { %v365_v61 = vsel %vm364_vm1, %v362_v59, %v354_v57  ;;  %v366_v62 = vsel %vm364_vm1, %v363_v60, %v358_v58 }
  0x4e   : > { %v369_v63 = vcombine.low %v365_v61, %v366_v62 }
  0x50   : > { %371 = vst [vmem:[%s235_s28] sm:$0x77] %v369_v63 }
  0x51 PF: > { %s15_s14 = sadd.s32 1, %s625_s14   ;;  %s756_s12 = smov %s621_s13 }
  0x52   : > { %p12_p4 = scmp.ge.s32.totalorder %s15_s14, 4   ;;  %s757_s13 = smov %s759_s16 }
  0x54   :  { %14 = sbr.rel (!%p12_p4) target bundleno = 3 (0x3), region = 71 }
  0x5b   :  { %402 = vsyncpa [#allocation3], 1 }
  0x5c   :  { %404 = vsyncpa [#allocation3 + $0x1], 1 }
  0x5d   :  { %405 = vsyncpa [#allocation5], 1 }

</bundles_post_ra>
